<compile_context>
chip_gen: v5e
topology: v5e:2x2
jax: 0.10.0
libtpu: 0.0.40
codegen_flags: <defaults>
</compile_context>

<pallas_src>
import functools

import numpy as np
import jax
import jax.numpy as jnp
from jax.experimental import pallas as pl
from jax.experimental.pallas import tpu as pltpu

KSIZE = 7        # conv kernel
PAD = 3          # conv padding
POOL_K = 5       # avg-pool kernel
POOL_PAD = 2     # avg-pool padding
BN_EPS = 1e-5


def _round_up(x, mult):
    return ((x + mult - 1) // mult) * mult


def _pick_tile_m(m, max_tile=2048):
    """Lane-aligned tile along the flattened pixel axis.

    Prefer >= 2 tiles (so the BlockSpec pipeline actually prefetches/writes back),
    never below 128 lanes, never above `max_tile` (VMEM headroom, incl. v7x 64 MiB)."""
    if m <= 128:
        return 128
    return min(max_tile, _round_up((m + 1) // 2, 128))


# ---------------------------------------------------------------------------
# Pass A: fused conv+pool+bias matmul, ReLU on conv channels, per-tile BN partials.
# ---------------------------------------------------------------------------
def _fused_act_stats_kernel(xct_ref, w_ref, act_ref, stats_ref, *, cout, m_true, tile_m):
    """xct: (KP, TM) bf16 transposed im2col patches (+ ones row for bias).
    w:   (CT, KP) bf16 fused conv|pool weights (+ bias column).
    act: (CT, TM) f32 pre-BN activations.  stats: (1, CT, 2) f32 (sum, sumsq)."""
    i = pl.program_id(0)

    # One MXU matmul does conv (rows [0, cout)), avg-pool (rows [cout, CT)) and bias.
    y = jnp.dot(w_ref[...], xct_ref[...], preferred_element_type=jnp.float32)  # (CT, TM)
    ct, tm = y.shape

    # ReLU only on the conv channels (row mask, single VPU select).
    row = jax.lax.broadcasted_iota(jnp.int32, (ct, tm), 0)
    y = jnp.where(row < cout, jnp.maximum(y, 0.0), y)

    # Single full-tile, lane-dense store of the pre-BN activations.
    act_ref[...] = y

    # Per-channel partial sums for BatchNorm; mask out the M-padding columns.
    col = jax.lax.broadcasted_iota(jnp.int32, (ct, tm), 1) + i * tile_m
    ym = jnp.where(col < m_true, y, 0.0)
    s = jnp.sum(ym, axis=1, keepdims=True)        # (CT, 1)
    s2 = jnp.sum(ym * ym, axis=1, keepdims=True)  # (CT, 1)
    stats_ref[...] = jnp.concatenate([s, s2], axis=1)[None]  # (1, CT, 2)


# ---------------------------------------------------------------------------
# Pass B: tiled BN normalize, single-pass scale/shift epilogue.
# ---------------------------------------------------------------------------
def _bn_apply_kernel(act_ref, scale_ref, shift_ref, out_ref):
    """act: (CT, TM) f32, scale/shift: (CT, 1) f32 broadcast along lanes."""
    out_ref[...] = act_ref[...] * scale_ref[...] + shift_ref[...]


# ---------------------------------------------------------------------------
# Wrapper
# ---------------------------------------------------------------------------
def _build_patches_t(x_nchw, kdim, kp, m, mp):
    """Transposed im2col: (KP, Mp) with row k=(ky*7+kx)*Cin+ci, plus a ones row (bias)."""
    n, cin, h, w = x_nchw.shape
    x_nhwc = jnp.transpose(x_nchw, (0, 2, 3, 1)).astype(jnp.float32)
    xpad = jnp.pad(x_nhwc, ((0, 0), (PAD, PAD), (PAD, PAD), (0, 0)))
    rows = []
    for ky in range(KSIZE):
        for kx in range(KSIZE):
            blk = xpad[:, ky:ky + h, kx:kx + w, :]                    # (N, H, W, Cin)
            rows.append(jnp.transpose(blk, (3, 0, 1, 2)).reshape(cin, m))
    xct = jnp.concatenate(rows, axis=0)                               # (196, M)
    ones = jnp.ones((1, m), jnp.float32)                              # bias rides the matmul
    zpad = jnp.zeros((kp - kdim - 1, m), jnp.float32)                 # pad K to sublane mult.
    xct = jnp.concatenate([xct, ones, zpad], axis=0)                  # (KP, M)
    if mp > m:
        xct = jnp.pad(xct, ((0, 0), (0, mp - m)))                     # lane padding (masked)
    return xct.astype(jnp.bfloat16)


def _build_fused_weight(weight, bias, cin, cout, kdim, kp):
    """(Ctot, KP) = [conv rows | pool rows] with bias column at index kdim."""
    ctot = cout + cin
    # conv rows: weight (Cout, Cin, 7, 7) -> (Cout, 7, 7, Cin) -> (Cout, 196), matches k order.
    wconv = jnp.transpose(weight, (0, 2, 3, 1)).reshape(cout, kdim).astype(jnp.float32)
    # pool rows: fixed selector over the central 5x5 taps, / 25 (count_include_pad=True).
    pool_np = np.zeros((cin, kdim), np.float32)
    for ky in range(KSIZE):
        for kx in range(KSIZE):
            inside = (PAD - POOL_PAD) <= ky <= (PAD + POOL_PAD) and \
                     (PAD - POOL_PAD) <= kx <= (PAD + POOL_PAD)
            if inside:
                for ci in range(cin):
                    pool_np[ci, (ky * KSIZE + kx) * cin + ci] = 1.0 / float(POOL_K * POOL_K)
    wmain = jnp.concatenate([wconv, jnp.asarray(pool_np)], axis=0)    # (Ctot, 196)
    bias_col = jnp.concatenate(
        [bias.astype(jnp.float32), jnp.zeros((cin,), jnp.float32)]).reshape(ctot, 1)
    zcol = jnp.zeros((ctot, kp - kdim - 1), jnp.float32)
    wfused = jnp.concatenate([wmain, bias_col, zcol], axis=1)          # (Ctot, KP)
    return wfused.astype(jnp.bfloat16)


def rand_scat_block(x_nchw, weight, bias, gamma, beta, *, max_tile_m=2048):
    """x: (N, Cin, H, W) f32; weight: (Cout, Cin, 7, 7); bias: (Cout,);
    gamma/beta: (Cin+Cout,).  Returns (N, Cout+Cin, H, W) f32 (NCHW, like PyTorch)."""
    n, cin, h, w = x_nchw.shape
    cout = weight.shape[0]
    ctot = cout + cin
    m = n * h * w
    kdim = KSIZE * KSIZE * cin                    # 196
    kp = _round_up(kdim + 1, 8)                   # + ones row, rounded to sublane multiple

    tm = _pick_tile_m(m, max_tile_m)
    mp = tm * ((m + tm - 1) // tm)
    num_tiles = mp // tm

    xct = _build_patches_t(x_nchw, kdim, kp, m, mp)                   # (KP, Mp) bf16
    wfused = _build_fused_weight(weight, bias, cin, cout, kdim, kp)   # (Ctot, KP) bf16

    cparams = pltpu.CompilerParams(
        dimension_semantics=("parallel",),        # independent M tiles (megacore / 2-TC v7x)
        vmem_limit_bytes=32 * 1024 * 1024,
    )

    # ---- pass A: fused matmul + ReLU + per-tile BN partials -------------------------
    kernel_a = functools.partial(
        _fused_act_stats_kernel, cout=cout, m_true=m, tile_m=tm)
    act, stats = pl.pallas_call(
        kernel_a,
        out_shape=(jax.ShapeDtypeStruct((ctot, mp), jnp.float32),
                   jax.ShapeDtypeStruct((num_tiles, ctot, 2), jnp.float32)),
        grid=(num_tiles,),
        in_specs=[
            pl.BlockSpec((kp, tm), lambda i: (0, i)),      # patch tile, pipelined over M
            pl.BlockSpec((ctot, kp), lambda i: (0, 0)),    # fused weights stay resident
        ],
        out_specs=(
            pl.BlockSpec((ctot, tm), lambda i: (0, i)),    # pre-BN activations (lane-dense)
            pl.BlockSpec((1, ctot, 2), lambda i: (i, 0, 0)),
        ),
        compiler_params=cparams,
    )(xct, wfused)

    # ---- tiny cross-tile reduction + single-pass scale/shift (plain JAX) ------------
    tot = jnp.sum(stats, axis=0)                              # (Ctot, 2)
    mean = tot[:, 0] / float(m)
    var = jnp.maximum(tot[:, 1] / float(m) - mean * mean, 0.0)   # biased var, cancel. guard
    inv_std = jax.lax.rsqrt(var + BN_EPS)
    scale_v = gamma.astype(jnp.float32) * inv_std
    shift_v = beta.astype(jnp.float32) - mean * scale_v
    scale = scale_v.reshape(ctot, 1)
    shift = shift_v.reshape(ctot, 1)

    # ---- pass B: tiled elementwise normalize (recycles the activation buffer) -------
    out_cm = pl.pallas_call(
        _bn_apply_kernel,
        out_shape=jax.ShapeDtypeStruct((ctot, mp), jnp.float32),
        grid=(num_tiles,),
        in_specs=[
            pl.BlockSpec((ctot, tm), lambda i: (0, i)),
            pl.BlockSpec((ctot, 1), lambda i: (0, 0)),
            pl.BlockSpec((ctot, 1), lambda i: (0, 0)),
        ],
        out_specs=pl.BlockSpec((ctot, tm), lambda i: (0, i)),
        input_output_aliases={0: 0},              # write BN output over the act buffer
        compiler_params=cparams,
    )(act, scale, shift)

    out = out_cm[:, :m].reshape(ctot, n, h, w)                # channels-major -> NCHW
    return jnp.transpose(out, (1, 0, 2, 3))


# ---------------------------------------------------------------------------
# Pure-JAX reference matching the PyTorch forward.
# ---------------------------------------------------------------------------
def _reference(x_nchw, weight, bias, gamma, beta):
    x = jnp.transpose(x_nchw, (0, 2, 3, 1))
    w_hwio = jnp.transpose(weight, (2, 3, 1, 0))
    h = jax.lax.conv_general_dilated(
        x, w_hwio, (1, 1), [(PAD, PAD), (PAD, PAD)],
        dimension_numbers=("NHWC", "HWIO", "NHWC"))
    h = jnp.maximum(h + bias, 0.0)
    xp = jnp.pad(x, ((0, 0), (POOL_PAD, POOL_PAD), (POOL_PAD, POOL_PAD), (0, 0)))
    pool = jax.lax.reduce_window(
        xp, 0.0, jax.lax.add, (1, POOL_K, POOL_K, 1), (1, 1, 1, 1), "VALID"
    ) / float(POOL_K * POOL_K)
    cat = jnp.concatenate([h, pool], axis=-1)
    mu = jnp.mean(cat, axis=(0, 1, 2), keepdims=True)
    var = jnp.mean((cat - mu) ** 2, axis=(0, 1, 2), keepdims=True)
    y = (cat - mu) * jax.lax.rsqrt(var + BN_EPS) * gamma + beta
    return jnp.transpose(y, (0, 3, 1, 2))


if __name__ == "__main__":
    # Module hyper-parameters (small shapes).
    N, IN_CHAN, H, W = 2, 4, 16, 16
    NUM_FILT = 12
    CTOT = IN_CHAN + NUM_FILT

    key = jax.random.PRNGKey(0)
    kx, kw, kb = jax.random.split(key, 3)

    # Deterministic stand-in for V1_init (same scale = 1 / (in_chan * k*k)).
    scale0 = 1.0 / (IN_CHAN * KSIZE * KSIZE)
    weight = jax.random.normal(kw, (NUM_FILT, IN_CHAN, KSIZE, KSIZE), jnp.float32) * jnp.sqrt(scale0)
    bias = jax.random.normal(kb, (NUM_FILT,), jnp.float32) * jnp.sqrt(scale0)
    gamma = jnp.ones((CTOT,), jnp.float32)   # BatchNorm affine defaults
    beta = jnp.zeros((CTOT,), jnp.float32)

    x = jax.random.normal(kx, (N, IN_CHAN, H, W), jnp.float32)

    out = rand_scat_block(x, weight, bias, gamma, beta)
    out = jax.block_until_ready(out)
    assert out.shape == (N, CTOT, H, W), out.shape

    ref = jax.block_until_ready(_reference(x, weight, bias, gamma, beta))
    max_diff = float(jnp.max(jnp.abs(out - ref)))
    assert max_diff < 5e-2, f"mismatch vs reference: {max_diff}"

    print("KERNEL_OK")
</pallas_src>

<mosaic_0001>
module attributes {stable_mosaic.version = 11 : i64} {
  func.func @_fused_act_stats_kernel(%arg0: i32, %arg1: memref<200x256xbf16, #tpu.memory_space<vmem>>, %arg2: memref<16x200xbf16, #tpu.memory_space<vmem>>, %arg3: memref<16x256xf32, #tpu.memory_space<vmem>>, %arg4: memref<1x16x2xf32, #tpu.memory_space<vmem>>) attributes {dimension_semantics = [#tpu.dimension_semantics<parallel>], iteration_bounds = array<i64: 2>, scalar_prefetch = 0 : i64, scratch_operands = 0 : i64, tpu.core_type = #tpu.core_type<tc>, window_params = [{transform_indices = @transform_0, window_bounds = array<i64: 200, 256>}, {pipeline_mode = #tpu.pipeline_mode<synchronous>, transform_indices = @transform_1, window_bounds = array<i64: 16, 200>}, {transform_indices = @transform_2, window_bounds = array<i64: 16, 256>}, {transform_indices = @transform_3, window_bounds = array<i64: 1, 16, 2>}]} {
    %c0 = arith.constant 0 : index
    %c0_0 = arith.constant 0 : index
    %0 = vector.load %arg2[%c0, %c0_0] : memref<16x200xbf16, #tpu.memory_space<vmem>>, vector<16x200xbf16>
    %c0_1 = arith.constant 0 : index
    %c0_2 = arith.constant 0 : index
    %1 = vector.load %arg1[%c0_1, %c0_2] : memref<200x256xbf16, #tpu.memory_space<vmem>>, vector<200x256xbf16>
    %cst = arith.constant dense<0.000000e+00> : vector<16x256xf32>
    %2 = tpu.matmul %0, %1, %cst {dimension_numbers = #tpu.dot_dimension_numbers<[1], [0], [0], [1], [0, 0, 1, 1], [], []>} : vector<16x200xbf16>, vector<200x256xbf16>, vector<16x256xf32> -> vector<16x256xf32>
    %3 = tpu.iota {dimensions = array<i32: 0>} : vector<16x256xi32>
    %c12_i32 = arith.constant 12 : i32
    %4 = vector.broadcast %c12_i32 : i32 to vector<16x256xi32>
    %5 = arith.cmpi slt, %3, %4 : vector<16x256xi32>
    %cst_3 = arith.constant 0.000000e+00 : f32
    %6 = vector.broadcast %cst_3 : f32 to vector<16x256xf32>
    %7 = arith.maximumf %2, %6 : vector<16x256xf32>
    %8 = arith.select %5, %7, %2 : vector<16x256xi1>, vector<16x256xf32>
    %c0_4 = arith.constant 0 : index
    %c0_5 = arith.constant 0 : index
    %9 = vector.load %arg3[%c0_4, %c0_5] : memref<16x256xf32, #tpu.memory_space<vmem>>, vector<16x256xf32>
    tpu.vector_store %arg3[%c0_4, %c0_5], %8 {strides = array<i32>} : memref<16x256xf32, #tpu.memory_space<vmem>>, vector<16x256xf32>,
    %10 = tpu.iota {dimensions = array<i32: 1>} : vector<16x256xi32>
    %c256_i32 = arith.constant 256 : i32
    %11 = arith.muli %arg0, %c256_i32 : i32
    %12 = vector.broadcast %11 : i32 to vector<16x256xi32>
    %13 = arith.addi %10, %12 : vector<16x256xi32>
    %c512_i32 = arith.constant 512 : i32
    %14 = vector.broadcast %c512_i32 : i32 to vector<16x256xi32>
    %15 = arith.cmpi slt, %13, %14 : vector<16x256xi32>
    %cst_6 = arith.constant 0.000000e+00 : f32
    %16 = vector.broadcast %cst_6 : f32 to vector<16x256xf32>
    %17 = arith.select %15, %8, %16 : vector<16x256xi1>, vector<16x256xf32>
    %cst_7 = arith.constant dense<0.000000e+00> : vector<16xf32>
    %18 = vector.multi_reduction <add>, %17, %cst_7 [1] : vector<16x256xf32> to vector<16xf32>
    %19 = vector.shape_cast %18 : vector<16xf32> to vector<16x1xf32>
    %20 = arith.mulf %17, %17 : vector<16x256xf32>
    %cst_8 = arith.constant dense<0.000000e+00> : vector<16xf32>
    %21 = vector.multi_reduction <add>, %20, %cst_8 [1] : vector<16x256xf32> to vector<16xf32>
    %22 = vector.shape_cast %21 : vector<16xf32> to vector<16x1xf32>
    %23 = tpu.concatenate %19, %22 in 1 : vector<16x1xf32>, vector<16x1xf32> -> vector<16x2xf32>
    %24 = vector.shape_cast %23 : vector<16x2xf32> to vector<1x16x2xf32>
    %c0_9 = arith.constant 0 : index
    %c0_10 = arith.constant 0 : index
    %c0_11 = arith.constant 0 : index
    %25 = vector.load %arg4[%c0_9, %c0_10, %c0_11] : memref<1x16x2xf32, #tpu.memory_space<vmem>>, vector<1x16x2xf32>
    tpu.vector_store %arg4[%c0_9, %c0_10, %c0_11], %24 {strides = array<i32>} : memref<1x16x2xf32, #tpu.memory_space<vmem>>, vector<1x16x2xf32>,
    return
  }
  func.func @transform_0(%arg0: i32) -> (i32, i32) {
    %c0_i32 = arith.constant 0 : i32
    %c0_i32_0 = arith.constant 0 : i32
    return %c0_i32, %arg0 : i32, i32
  }
  func.func @transform_1(%arg0: i32) -> (i32, i32) {
    %c0_i32 = arith.constant 0 : i32
    %c0_i32_0 = arith.constant 0 : i32
    %c0_i32_1 = arith.constant 0 : i32
    return %c0_i32, %c0_i32_0 : i32, i32
  }
  func.func @transform_2(%arg0: i32) -> (i32, i32) {
    %c0_i32 = arith.constant 0 : i32
    %c0_i32_0 = arith.constant 0 : i32
    return %c0_i32, %arg0 : i32, i32
  }
  func.func @transform_3(%arg0: i32) -> (i32, i32, i32) {
    %c0_i32 = arith.constant 0 : i32
    %c0_i32_0 = arith.constant 0 : i32
    %c0_i32_1 = arith.constant 0 : i32
    return %arg0, %c0_i32, %c0_i32_0 : i32, i32, i32
  }
}

</mosaic_0001>

<bundles_post_ra>
// kernel: tpu_custom_call.1
= control target key start
LH: loop header
LB: loop body
LE: loop exit
PB: predicated region body
PF: predicated region fallthrough
CT: control target
= control target key end

     0   :  { %9 = vsyncpa [#allocation3], 0  ;;  %s1229_s0 = inlined_call_operand.hbm [shape: bf16[200,512], index: 0, kind: input, shape index: {}]   ;;  %s1230_s1 = inlined_call_operand.hbm [shape: bf16[16,200], index: 1, kind: input, shape index: {}]   ;;  %s1231_s2 = inlined_call_operand.hbm [shape: f32[16,512], index: 2, kind: output, shape index: {0}]   ;;  %s1232_s3 = inlined_call_operand.vmem [shape: f32[2,16,2], index: 3, kind: output, shape index: {1}]  }
   0x1   :  { %11 = vsyncpa [#allocation3 + $0x1], 0 }
   0x2   :  { %12 = vsyncpa [#allocation6], 0 }
   0x3   :  { %13 = vsyncpa [#allocation4], 0 }
   0x4   :  { %15 = vsyncpa [#allocation4 + $0x1], 0  ;;  %s1012_s12 = smov 0   ;;  %s1014_s13 = smov 0  }
   0x5   :  { %s1016_s14 = smov 0   ;;  %s1018_s15 = smov 0  }
   0x6 LB: > { %s1033_s16 = sadd.s32 4294967295, %s983_s15   ;;  %s636_s17 = sadd.s32 4294967294, %s983_s15   ;;  %s983_s15 = sphi %s1018_s15, %s1244_s15   ;;  %s979_s14 = sphi %s1016_s14, %s1243_s14   ;;  %s975_s13 = sphi %s1014_s13, %s1242_s13   ;;  %s971_s12 = sphi %s1012_s12, %s1241_s12  }
   0x7   : > { %p41_p0 = scmp.ne.s32.totalorder %s975_s13, %s971_s12  ;;  %p42_p1 = scmp.eq.s32.totalorder %s1033_s16, 0 }
   0x8   : > { %p86_p2 = scmp.eq.s32.totalorder %s1033_s16, 1  ;;  %p92_p3 = scmp.eq.s32.totalorder %s636_s17, 1 }
   0x9   : > { %p1042_p4 = por %p42_p1, %p41_p0  ;;  %p637_p5 = scmp.ge.s32.totalorder %s983_s15, 1 }
   0xa   : > { %p1047_p6 = por %p92_p3, %p41_p0  ;;  %p125_p7 = scmp.lt.s32.totalorder %s983_s15, 3 }
   0xb   : > { %s136_s22 = sshll.u32 %s1230_s1, 4  ;;  %s985_s24 = smov [#allocation5]   ;;  %s137_s22 = int_to_ptr.hbm [resolvable:$true] %s136_s22 }
   0xc   : > { %p1055_p8 = pnand %p637_p5, %p125_p7  ;;  %s138_s25 = sshll.u32 %s985_s24, 4  ;;  %s139_s25 = int_to_ptr.vmem [resolvable:$true] %s138_s25 }
   0xd   : > { %s1065_s26 = sadd.s32 1, %s983_s15   ;;  %s1233_s27 = smov 128  }
   0xe   : > { %p798_p9 = pneg %p1055_p8  ;;  %s987_s28 = smov 8  }
   0xf   : > { %s25_s29 = ssub.s32 %s983_s15, %s1065_s26  ;;  %s28_s30 = sadd.s32 1, %s979_s14 }
  0x10   : > { %p799_p10 = pnand %p798_p9, %p42_p1  ;;  %p26_p12 = scmp.eq.s32.totalorder %s25_s29, 0 }
  0x11   : > { %p35_p13 = scmp.ne.s32.totalorder %s979_s14, %s975_s13  ;;  %p36_p0 = scmp.eq.s32.totalorder %s983_s15, 0 }
  0x12   : > { %801 = dma.hbm_to_vmem [thread:$0]  (!%p799_p10), %s137_s22, 256, %s139_s25, [#allocation6], %s1233_s27, %s1233_s27, %s987_s28  }
  0x13   : > { %p811_p3 = scmp.lt.s32.totalorder %s983_s15, 2  ;;  %p37_p5 = por %p36_p0, %p35_p13 }
  0x14   : > { %s1078_s4 = scalar_select %p26_p12, %s979_s14, %s28_s30  }
  0x15   : > { %p1082_p7 = por %p86_p2, %p35_p13  ;;  %s152_s6 = sand.u32 1, %s979_s14  }
  0x16   : > { %s759_s7 = sshll.u32 %s983_s15, 3  ;;  %s788_s8 = smul.u32 200, %s152_s6 }
  0x17   : > { %s161_s11 = scalar_lea.hbm %s1229_s0, %s759_s7  ;;  %p1091_p9 = pnand %p811_p3, %p37_p5 }
  0x18   : > { %s162_s20 = sshll.u32 %s161_s11, 4  ;;  %s156_s21 = scalar_lea.vmem [#allocation2], %s788_s8  ;;  %s163_s20 = int_to_ptr.hbm [resolvable:$true] %s162_s20 }
  0x19   : > { %s164_s22 = sshll.u32 %s156_s21, 4  ;;  %s153_s24 = scalar_lea.sflag [#allocation3], %s152_s6  ;;  %s165_s22 = int_to_ptr.vmem [resolvable:$true] %s164_s22 }
  0x1a   : > { %s883_s25 = sshra.s32 %s163_s20, 4  ;;  %p887_p10 = pneg %p1091_p9  ;;  %s884_s25 = int_to_ptr.hbm [resolvable:$true] %s883_s25 }
  0x1b   : > { %s885_s29 = scalar_lea.hbm %s884_s25, 200  ;;  %s890_s9 = scalar_lea.hbm %s1229_s0, 400 }
  0x1c   : > { %p886_p2 = scmp.ne.s32.totalorder %s884_s25, %s885_s29  ;;  %p891_p0 = scmp.lt.s32.totalorder %s884_s25, %s1229_s0 }
  0x1d   : > { %p892_p3 = scmp.lt.s32.totalorder %s890_s9, %s885_s29 }
  0x1e   : > { %p888_p12 = pnand %p887_p10, %p886_p2 }
  0x1f   : > { %p893_p5 = por %p892_p3, %p891_p0 }
  0x20   : > { %p889_p13 = pneg %p888_p12 }
  0x22   : > { %p894_p11 = pnand %p893_p5, %p889_p13 }
  0x24   : > { %897 = shalt.err (!%p894_p11)
}
  0x25   : > { %s988_s6 = smov 256   ;;  %s1239_s8 = smov 128  }
  0x26   : > { %805 = dma.hbm_to_vmem [thread:$0]  (!%p1091_p9), %s163_s20, 3200, %s165_s22, %s153_s24, %s988_s6, %s1239_s8, %s987_s28  }
  0x27   : > { %176 = sbr.rel (%p1055_p8) target bundleno = 350 (0x15e), region = 28  ;;  %s1110_s11 = sand.u32 (!%p1055_p8), 1, %s975_s13  }
  0x28   : > { %s789_s27 = smul.u32 (!%p1055_p8), 200, %s1110_s11  ;;  %s179_s21 = scalar_lea.sflag (!%p1055_p8), [#allocation3], %s1110_s11 }
  0x2a   : > { %s1114_s25 = scalar_lea.vmem (!%p1055_p8), [#allocation2], %s789_s27 }
  0x2c   : > { %958 = dma.done.wait (%p1042_p4), %s179_s21, 3200  }
  0x2d   : > { %960 = vsyncadd (%p1042_p4), %s179_s21, 4294964096 }
  0x2e   : > { %962 = dma.done.wait (%p42_p1), [#allocation6], 256  }
  0x2f   : > { %964 = vsyncadd (%p42_p1), [#allocation6], 4294967040  ;;  %v713_v0 = vld [vmem:[%s1114_s25 + $0x70] sm:$0xf]  ;;  %v778_v1 = vld [vmem:[%s1114_s25 + $0x74] sm:$0xf0] }
  0x30   : > { %v777_v2 = vld [vmem:[%s1114_s25 + $0x74] sm:$0xf]  ;;  %v714_v3 = vor.u32 %v778_v1, %v713_v0  ;;  %v715_v4 = vld [vmem:[%s1114_s25 + $0x78] sm:$0xf0]  ;;  %v705_v5 = vld [vmem:[%s1114_s25 + $0x60] sm:$0xf] }
  0x31   : > { %v776_v6 = vld [vmem:[%s1114_s25 + $0x64] sm:$0xf0]  ;;  %v718_v7 = vor.u32 %v777_v2, %v715_v4  ;;  %v775_v8 = vld [vmem:[%s1114_s25 + $0x64] sm:$0xf]  ;;  %v707_v9 = vld [vmem:[%s1114_s25 + $0x68] sm:$0xf0] }
  0x32   : > { %v250_v10 = vld [vmem:[%s1114_s25 + $0xc0] sm:$0xff]  ;;  %396 = vmatpush.bf16.msra.mxu0 %v714_v3  ;;  %v706_v11 = vor.u32 %v776_v6, %v705_v5  ;;  %vm389_vm0 = vcmask 1043456   ;;  %v710_v14 = vor.u32 %v775_v8, %v707_v9  ;;  %v697_v15 = vld [vmem:[%s1114_s25 + $0x50] sm:$0xf]  ;;  %v774_v16 = vld [vmem:[%s1114_s25 + $0x54] sm:$0xf0] }
  0x33   : > { %v334_v12 = vunpack.c.h.b16 %v250_v10  ;;  %v333_v13 = vunpack.c.l.b16 %v250_v10  ;;  %424 = vmatpush.bf16.msra.mxu2 %v718_v7  ;;  %v773_v17 = vld [vmem:[%s1114_s25 + $0x54] sm:$0xf]  ;;  %v699_v19 = vld [vmem:[%s1114_s25 + $0x58] sm:$0xf0]  ;;  %v698_v24 = vor.u32 %v774_v16, %v697_v15  ;;  %v745_v26 = vld [vmem:[%s1114_s25 + $0xb0] sm:$0xf] }
  0x34   : > { %v785_v20 = vld [vmem:[%s1114_s25 + $0xb4] sm:$0xf]  ;;  %v747_v21 = vld [vmem:[%s1114_s25 + $0xb8] sm:$0xf0]  ;;  %v786_v27 = vld [vmem:[%s1114_s25 + $0xb4] sm:$0xf0]  ;;  %v702_v28 = vor.u32 %v773_v17, %v699_v19 }
  0x35   : > { %v360_v18 = vpack.c.b16 %v334_v12, %v334_v12  ;;  %v359_v22 = vpack.c.b16 %v333_v13, %v333_v13  ;;  %v750_v29 = vor.u32 %v785_v20, %v747_v21  ;;  %v689_v30 = vld [vmem:[%s1114_s25 + $0x40] sm:$0xf]  ;;  %v772_v31 = vld [vmem:[%s1114_s25 + $0x44] sm:$0xf0]  ;;  %v771_v32 = vld [vmem:[%s1114_s25 + $0x44] sm:$0xf]  ;;  %v746_v36 = vor.u32 %v786_v27, %v745_v26 }
  0x36   : > { %397 = vmatpush.bf16.msra.mxu0 %v706_v11  ;;  %v691_v33 = vld [vmem:[%s1114_s25 + $0x48] sm:$0xf0]  ;;  %v783_v34 = vld [vmem:[%s1114_s25 + $0xa4] sm:$0xf]  ;;  %v737_v37 = vld [vmem:[%s1114_s25 + $0xa0] sm:$0xf]  ;;  %v690_v39 = vor.u32 %v772_v31, %v689_v30  ;;  %v452_v21 = vlaneseq }
  0x37   : > { %v394_v23 = vsel %vm389_vm0, %v360_v18, 0  ;;  %v391_v25 = vsel %vm389_vm0, %v359_v22, 0  ;;  %425 = vmatpush.bf16.msra.mxu2 %v710_v14  ;;  %v739_v35 = vld [vmem:[%s1114_s25 + $0xa8] sm:$0xf0]  ;;  %v784_v38 = vld [vmem:[%s1114_s25 + $0xa4] sm:$0xf0]  ;;  %v694_v40 = vor.u32 %v771_v32, %v691_v33 }
  0x38   : > { %441 = vmatpush.bf16.msra.mxu3 %v394_v23  ;;  %413 = vmatpush.bf16.msra.mxu1 %v391_v25  ;;  %v742_v41 = vor.u32 %v783_v34, %v739_v35  ;;  %v681_v42 = vld [vmem:[%s1114_s25 + $0x30] sm:$0xf]  ;;  %v770_v43 = vld [vmem:[%s1114_s25 + $0x34] sm:$0xf0]  ;;  %v769_v44 = vld [vmem:[%s1114_s25 + $0x34] sm:$0xf]  ;;  %v738_v48 = vor.u32 %v784_v38, %v737_v37 }
  0x39   : > { %v683_v45 = vld [vmem:[%s1114_s25 + $0x38] sm:$0xf0]  ;;  %v781_v46 = vld [vmem:[%s1114_s25 + $0x94] sm:$0xf]  ;;  %v729_v49 = vld [vmem:[%s1114_s25 + $0x90] sm:$0xf]  ;;  %v682_v51 = vor.u32 %v770_v43, %v681_v42 }
  0x3a   : > { %398 = vmatpush.bf16.msra.mxu0 %v698_v24  ;;  %v731_v47 = vld [vmem:[%s1114_s25 + $0x98] sm:$0xf0]  ;;  %v782_v50 = vld [vmem:[%s1114_s25 + $0x94] sm:$0xf0]  ;;  %v686_v52 = vor.u32 %v769_v44, %v683_v45  ;;  %v673_v54 = vld [vmem:[%s1114_s25 + $0x20] sm:$0xf] }
  0x3b   : > { %426 = vmatpush.bf16.msra.mxu2 %v702_v28  ;;  %v734_v53 = vor.u32 %v781_v46, %v731_v47  ;;  %v768_v55 = vld [vmem:[%s1114_s25 + $0x24] sm:$0xf0]  ;;  %v767_v56 = vld [vmem:[%s1114_s25 + $0x24] sm:$0xf]  ;;  %v675_v57 = vld [vmem:[%s1114_s25 + $0x28] sm:$0xf0]  ;;  %v730_v60 = vor.u32 %v782_v50, %v729_v49 }
  0x3c   : > { %442 = vmatpush.bf16.msra.mxu3 %v750_v29  ;;  %414 = vmatpush.bf16.msra.mxu1 %v746_v36  ;;  %v779_v58 = vld [vmem:[%s1114_s25 + $0x84] sm:$0xf]  ;;  %v723_v59 = vld [vmem:[%s1114_s25 + $0x88] sm:$0xf0]  ;;  %v721_v61 = vld [vmem:[%s1114_s25 + $0x80] sm:$0xf]  ;;  %v674_v63 = vor.u32 %v768_v55, %v673_v54  ;;  %v678_v1 = vor.u32 %v767_v56, %v675_v57 }
  0x3d   : > { %v780_v62 = vld [vmem:[%s1114_s25 + $0x84] sm:$0xf0]  ;;  %v761_v0 = vld [vmem:[#allocation5 + $0x4] sm:$0xf]  ;;  %v726_v2 = vor.u32 %v779_v58, %v723_v59  ;;  %v651_v3 = vld [vmem:[#allocation5 + $0x8] sm:$0xf0] }
  0x3e   : > { %399 = vmatpush.bf16.msra.mxu0 %v690_v39  ;;  %v665_v4 = vld [vmem:[%s1114_s25 + $0x10] sm:$0xf]  ;;  %v766_v5 = vld [vmem:[%s1114_s25 + $0x14] sm:$0xf0]  ;;  %v765_v6 = vld [vmem:[%s1114_s25 + $0x14] sm:$0xf]  ;;  %v722_v8 = vor.u32 %v780_v62, %v721_v61  ;;  %v654_v9 = vor.u32 %v761_v0, %v651_v3 }
  0x3f   : > { %427 = vmatpush.bf16.msra.mxu2 %v694_v40  ;;  %v667_v7 = vld [vmem:[%s1114_s25 + $0x18] sm:$0xf0]  ;;  %v666_v10 = vor.u32 %v766_v5, %v665_v4  ;;  %vm385_vm1 = vcmask 588800   ;;  %v657_v12 = vld [vmem:[%s1114_s25] sm:$0xf]  ;;  %s753_s18 = sshll.u32 %s1033_s16, 8 }
  0x40   : > { %443 = vmatpush.bf16.msra.mxu3 %v742_v41  ;;  %415 = vmatpush.bf16.msra.mxu1 %v738_v48  ;;  %v670_v11 = vor.u32 %v765_v6, %v667_v7  ;;  %v764_v13 = vld [vmem:[%s1114_s25 + $0x4] sm:$0xf0]  ;;  %v763_v14 = vld [vmem:[%s1114_s25 + $0x4] sm:$0xf]  ;;  %v659_v15 = vld [vmem:[%s1114_s25 + $0x8] sm:$0xf0]  ;;  %v473_v24 = vstv %s753_s18 }
  0x41   : > { %v658_v16 = vor.u32 %v764_v13, %v657_v12  ;;  %v649_v17 = vld [vmem:[#allocation5] sm:$0xf]  ;;  %v762_v18 = vld [vmem:[#allocation5 + $0x4] sm:$0xf0]  ;;  %v662_v19 = vor.u32 %v763_v14, %v659_v15  ;;  %v470_v22 = vand.u32 127, %v452_v21  ;;  %s644_s23 = sshll.u32 %s1110_s11, 5 }
  0x42   : > { %400 = vmatpush.bf16.msra.mxu0 %v682_v51  ;;  %v650_v20 = vor.u32 %v762_v18, %v649_v17  ;;  %v453_v29 = vshrl.u32 %v452_v21, 7  ;;  %s1175_s28 = scalar_lea.vmem [#allocation7], %s644_s23  ;;  %s787_s17 = sshll.u32 %s1033_s16, 4 }
  0x43   : > { %428 = vmatpush.bf16.msra.mxu2 %v686_v52  ;;  %v471_v27 = vadd.s32 128, %v470_v22  ;;  %v474_v28 = vadd.s32 %v473_v24, %v470_v22  ;;  %s521_s24 = scalar_lea.hbm %s1231_s2, %s787_s17  ;;  %s522_s29 = sshll.u32 %s1175_s28, 4  ;;  %s1188_s29 = int_to_ptr.vmem [resolvable:$true] %s522_s29 }
  0x44   : > { %444 = vmatpush.bf16.msra.mxu3 %v734_v53  ;;  %416 = vmatpush.bf16.msra.mxu1 %v730_v60  ;;  %v454_v33 = vadd.s32 8, %v453_v29  ;;  %s524_s30 = sshll.u32 %s521_s24, 4  ;;  %s505_s7 = scalar_lea.sflag [#allocation4], %s1110_s11  ;;  %s525_s30 = int_to_ptr.hbm [resolvable:$true] %s524_s30 }
  0x45   : > { %v475_v32 = vadd.s32 %v473_v24, %v471_v27  ;;  %vm476_vm2 = vcmp.lt.s32.totalorder %v474_v28, 512  ;;  %s927_s9 = sshra.s32 %s525_s30, 4  ;;  %s933_s27 = scalar_lea.hbm %s1231_s2, 64  ;;  %s928_s9 = int_to_ptr.hbm [resolvable:$true] %s927_s9 }
  0x46   : > { %401 = vmatpush.bf16.msra.mxu0 %v674_v63  ;;  %vm456_vm4 = vcmp.lt.s32.totalorder %v454_v33, 12  ;;  %s929_s10 = scalar_lea.hbm %s928_s9, 32  ;;  %p934_p11 = scmp.lt.s32.totalorder %s928_s9, %s1231_s2 }
  0x47   : > { %429 = vmatpush.bf16.msra.mxu2 %v678_v1  ;;  %vm477_vm3 = vcmp.lt.s32.totalorder %v475_v32, 512  ;;  %p930_p1 = scmp.ne.s32.totalorder %s928_s9, %s929_s10  ;;  %p935_p9 = scmp.lt.s32.totalorder %s933_s27, %s929_s10 }
  0x48   : > { %445 = vmatpush.bf16.msra.mxu3 %v726_v2  ;;  %417 = vmatpush.bf16.msra.mxu1 %v722_v8 }
  0x49   : > { %p931_p4 = pnand %p930_p1, %p1082_p7  ;;  %p936_p2 = por %p935_p9, %p934_p11 }
  0x4a   : > { %402 = vmatpush.bf16.msra.mxu0 %v666_v10 }
  0x4b   : > { %752 = vmatmul.msk.bf16.vlgmr.msra.gmra.mxu3 %vm385_vm1, %v654_v9  ;;  %430 = vmatpush.bf16.msra.mxu2 %v670_v11  ;;  %p932_p8 = pneg %p931_p4 }
  0x4c   : > { %751 = vmatmul.msk.bf16.vlgmr.msra.gmra.mxu1 %vm385_vm1, %v654_v9 }
  0x4d   : > { %p937_p10 = pnand %p936_p2, %p932_p8 }
  0x4e   : > { %403 = vmatpush.bf16.msra.mxu0 %v658_v16 }
  0x4f   : > { %431 = vmatpush.bf16.msra.mxu2 %v662_v19 }
  0x51   : > { %404 = vmatmul.bf16.vlgmr.msra.gmra.mxu0 %v650_v20 }
  0x52   : > { %432 = vmatmul.bf16.vlgmr.msra.gmra.mxu2 %v650_v20 }
  0xc9   : > { %v419_v23 = vpop.f32.mrf.mxu1 }
  0xce   : > { %v405_v25 = vpop.f32.mrf.mxu0  ;;  %v447_v31 = vpop.f32.mrf.mxu3 }
  0xcf   : > { %v420_v26 = vadd.f32 %v419_v23, %v405_v25 }
  0xd1   : > { %v457_v30 = vmax.f32 %v420_v26, 0.0  ;;  %v421_v35 = vpop.f32.mrf.mxu1 }
  0xd3   : > { %465 = vst [vmem:[%s1175_s28] sm:$0xff] %v457_v30  ;;  %v478_v38 = vsel %vm476_vm2, %v457_v30, 0.0 }
  0xd4   : > { %v488_v42 = vmul.f32 %v478_v38, %v478_v38 }
  0xd5   : > { %v433_v34 = vpop.f32.mrf.mxu2 }
  0xd6   : > { %v448_v36 = vadd.f32 %v447_v31, %v433_v34  ;;  %v407_v37 = vpop.f32.mrf.mxu0  ;;  %v449_v47 = vpop.f32.mrf.mxu3 }
  0xd7   : > { %v422_v39 = vadd.f32 %v421_v35, %v407_v37 }
  0xd8   : > { %v458_v40 = vmax.f32 %v448_v36, 0.0 }
  0xd9   : > { %v459_v41 = vmax.f32 %v422_v39, 0.0 }
  0xda   : > { %466 = vst [vmem:[%s1175_s28 + $0x8] sm:$0xff] %v458_v40  ;;  %v479_v43 = vsel %vm477_vm3, %v458_v40, 0.0 }
  0xdb   : > { %v482_v44 = vadd.f32 %v479_v43, %v478_v38  ;;  %v489_v45 = vmul.f32 %v479_v43, %v479_v43  ;;  %v463_v46 = vsel %vm456_vm4, %v459_v41, %v422_v39 }
  0xdc   : > { %467 = vst [vmem:[%s1175_s28 + $0x10] sm:$0xff] %v463_v46  ;;  %v480_v52 = vsel %vm476_vm2, %v463_v46, 0.0 }
  0xdd   : > { %v435_v48 = vpop.f32.mrf.mxu2  ;;  %483 = vadd.xlane.f32.xlu0 %v482_v44  ;;  %v492_v49 = vadd.f32 %v489_v45, %v488_v42  ;;  %v490_v56 = vmul.f32 %v480_v52, %v480_v52 }
  0xde   : > { %v450_v50 = vadd.f32 %v449_v47, %v435_v48 }
  0xdf   : > { %493 = vadd.xlane.f32.xlu1 %v492_v49 }
  0xe0   : > { %v460_v51 = vmax.f32 %v450_v50, 0.0 }
  0xe2   : > { %v464_v53 = vsel %vm456_vm4, %v460_v51, %v450_v50 }
  0xe3   : > { %468 = vst [vmem:[%s1175_s28 + $0x18] sm:$0xff] %v464_v53  ;;  %v481_v54 = vsel %vm477_vm3, %v464_v53, 0.0 }
  0xe4   : > { %v485_v55 = vadd.f32 %v481_v54, %v480_v52  ;;  %v491_v57 = vmul.f32 %v481_v54, %v481_v54 }
  0xe5   : > { %940 = shalt.err (!%p937_p10)
}
  0xe6   : > { %s989_s11 = smov 256   ;;  %s990_s18 = smov 512   ;;  %486 = vadd.xlane.f32.xlu0 %v485_v55  ;;  %v495_v58 = vadd.f32 %v491_v57, %v490_v56  ;;  %vm498_vm5 = vcmask 7168   ;;  %vm501_vm6 = vcmask 15360  }
  0xe7   : > { %s991_s23 = smov 16   ;;  %p218_p12 = scmp.lt.s32.totalorder %s1033_s16, 1 }
  0xe8   : > { %796 = dma.vmem_to_hbm [thread:$0]  (%p1082_p7), %s1188_s29, 512, %s525_s30, %s505_s7, %s989_s11, %s990_s18, %s991_s23   ;;  %496 = vadd.xlane.f32.xlu1 %v495_v58 }
  0xe9   : > { %s1246_s16 = smov (!%p218_p12, %s1033_s16), 1 }
  0xea   : > { %s760_s28 = sshll.u32 %s1246_s16, 4 }
  0xeb   : > { %s222_s22 = scalar_lea.vmem %s1232_s3, %s760_s28 }
 0x150   : > { %v484_v59 = vpop.xlane.xlu0 %483 }
 0x152   : > { %v494_v60 = vpop.xlane.xlu1 %493 }
 0x153   : > { %v499_v61 = vsel %vm498_vm5, %v484_v59, %v494_v60 }
 0x154   : > { %502 = vst.msk [vmem:[%s222_s22] sm:$0xff] %vm501_vm6, %v499_v61 }
 0x159   : > { %v487_v62 = vpop.xlane.xlu0 %486 }
 0x15b   : > { %v497_v63 = vpop.xlane.xlu1 %496 }
 0x15c   : > { %v500_v0 = vsel %vm498_vm5, %v487_v62, %v497_v63 }
 0x15d   : > { %503 = vst.msk [vmem:[%s222_s22 + $0x8] sm:$0xff] %vm501_vm6, %v500_v0 }
 0x15e PF: > { %s542_s5 = sand.u32 1, %s971_s12   ;;  %p1240_p7 = scmp.ge.s32.totalorder %s983_s15, 2 }
 0x15f   : > { %s543_s16 = scalar_lea.sflag [#allocation4], %s542_s5 }
 0x160   : > { %p807_p13 = pnand %p1240_p7, %p1047_p6 }
 0x162   : > { %p808_p0 = pneg %p807_p13 }
 0x164   : > { %966 = dma.done.wait (%p808_p0), %s543_s16, 512  }
 0x165   : > { %968 = vsyncadd (%p808_p0), %s543_s16, 4294966784  ;;  %p18_p3 = scmp.ge.s32.totalorder %s1065_s26, 4   ;;  %s1241_s12 = smov %s975_s13 }
 0x166   : > { %s1242_s13 = smov %s979_s14  ;;  %s1243_s14 = smov %s1078_s4 }
 0x167   : > { %s1244_s15 = smov %s1065_s26  ;;  %20 = sbr.rel (!%p18_p3) target bundleno = 6 (0x6), region = 89 }
 0x16c   :  { %557 = vsyncpa [#allocation3], 1 }
 0x16d   :  { %559 = vsyncpa [#allocation3 + $0x1], 1 }
 0x16e   :  { %560 = vsyncpa [#allocation6], 1 }
 0x16f   :  { %561 = vsyncpa [#allocation4], 1 }
 0x170   :  { %563 = vsyncpa [#allocation4 + $0x1], 1 }

</bundles_post_ra>
